<compile_context>
chip_gen: v6e
topology: v6e:2x2x1
jax: 0.10.0
libtpu: 0.0.40
codegen_flags: <defaults>
</compile_context>

<pallas_src>
import functools

import jax
import jax.numpy as jnp
from jax.experimental import pallas as pl
from jax.experimental.pallas import tpu as pltpu

_NEG = -1.0e30                      # finite "minus infinity" for masked classes


def _round_up(a, b):
    return ((a + b - 1) // b) * b


# --------------------------------------------------------------------------
# Kernel
# --------------------------------------------------------------------------
def _si_nll_kernel(x_ref, w_ref, b_ref, y_ref, out_ref, *,
                   n_classes, off2, lambda_c, approx_recip):
    # Cast the activation tile to the matmul dtype in-kernel (no wrapper-side
    # pad/cast HBM round trip).
    x = x_ref[...].astype(w_ref.dtype)           # (TB, D)
    y = y_ref[...]                                # (TB, 1) int32, padded rows = -1
    tb = x.shape[0]
    width = w_ref.shape[1]                        # 128 (packed) or 2*c_pad

    # ---- fused h1|h2 head: one MXU matmul, f32 accumulation ----
    logits = jnp.dot(x, w_ref[...], preferred_element_type=jnp.float32) + b_ref[...]

    lane = jax.lax.broadcasted_iota(jnp.int32, (tb, width), 1)
    in_h1 = lane < n_classes                                   # h1 classes
    in_h2 = jnp.logical_and(lane >= off2, lane < off2 + n_classes)  # h2 classes

    logits1 = jnp.where(in_h1, logits, _NEG)
    logits2 = jnp.where(in_h2, logits, _NEG)

    # ---- h1 softmax (approx reciprocal -> EUP slot, ~1e-3 rel error) ----
    m1 = jnp.max(logits1, axis=1, keepdims=True)
    e1 = jnp.exp(logits1 - m1)                                  # masked lanes -> 0
    s1 = jnp.sum(e1, axis=1, keepdims=True)
    if approx_recip:
        sm1 = e1 * pl.reciprocal(s1, approx=True)
    else:
        sm1 = e1 / s1

    # ---- h2 log-softmax (no exp/log round trip) ----
    m2 = jnp.max(logits2, axis=1, keepdims=True)
    sh2 = logits2 - m2
    lse2 = jnp.log(jnp.sum(jnp.exp(sh2), axis=1, keepdims=True))
    logsm2 = sh2 - lse2                                         # masked lanes ~ -1e30

    # ---- h1 argmax (first max, matching torch .max(1)[1]) / support mask ----
    is_max1 = logits1 >= m1
    pred1 = jnp.min(jnp.where(is_max1, lane, width), axis=1, keepdims=True)
    correct = (pred1 == y).astype(jnp.float32)                  # padded rows (y=-1) -> 0

    # ---- dissonance over support rows: sum_c(-softmax1[c] * log_softmax2[c]) ----
    if off2 % 128 == 0:
        # Heads live in separate 128-aligned lane groups: direct slices.
        row_diss = jnp.sum(-sm1[:, :n_classes] * logsm2[:, off2:off2 + n_classes],
                           axis=1, keepdims=True)
    else:
        # Packed heads share one 128-lane group: align softmax1 onto h2's lanes
        # with a constant shift matrix on the MXU (layout-safe alignment).
        src = jax.lax.broadcasted_iota(jnp.int32, (width, width), 0)
        dst = jax.lax.broadcasted_iota(jnp.int32, (width, width), 1)
        shift_m = jnp.logical_and(dst == src + off2, src < n_classes).astype(jnp.float32)
        sm1_on_h2 = jnp.dot(sm1, shift_m, preferred_element_type=jnp.float32)
        # Off-head lanes: sm1_on_h2 is exactly 0, so 0 * (-1e30) == 0 (f32 safe).
        row_diss = jnp.sum(-sm1_on_h2 * logsm2, axis=1, keepdims=True)
    diss_partial = jnp.sum(correct * row_diss)

    # ---- NLL partial: -sum_rows log_softmax2[row, y[row]] (masked select) ----
    tgt = jnp.where(y >= 0, y + off2, -1)                       # padded rows never match
    nll_partial = -jnp.sum(jnp.where(lane == tgt, logsm2, 0.0))

    # Single lane-dense per-tile partial (lambda_c folded); reduced in wrapper.
    out_ref[...] = jnp.full(out_ref.shape,
                            nll_partial + lambda_c * diss_partial, jnp.float32)


# --------------------------------------------------------------------------
# Parameter packing (hoist out of the per-call hot path)
# --------------------------------------------------------------------------
def pack_si_params(w1, b1, w2, b2, *, matmul_dtype=jnp.bfloat16):
    """Pack [h1 | h2] classifier heads once per weight set."""
    D, C = w1.shape
    packed = (2 * C) <= 128
    if packed:
        width, off2 = 128, C                       # both heads in one lane group
    else:
        c_pad = _round_up(C, 128)
        width, off2 = 2 * c_pad, c_pad             # one 128-padded group per head

    w_f = jnp.zeros((D, width), jnp.float32)
    w_f = w_f.at[:, :C].set(w1.astype(jnp.float32))
    w_f = w_f.at[:, off2:off2 + C].set(w2.astype(jnp.float32))
    b_f = jnp.zeros((1, width), jnp.float32)
    b_f = b_f.at[:, :C].set(b1.reshape(1, C).astype(jnp.float32))
    b_f = b_f.at[:, off2:off2 + C].set(b2.reshape(1, C).astype(jnp.float32))

    return {"w": w_f.astype(matmul_dtype), "b": b_f,
            "n_classes": int(C), "off2": int(off2), "width": int(width),
            "packed": bool(packed)}


# --------------------------------------------------------------------------
# Tiling heuristics (generation aware)
# --------------------------------------------------------------------------
def _vmem_limit_bytes():
    try:
        cap = int(pltpu.get_tpu_info().vmem_capacity_bytes)
    except Exception:
        cap = 64 * 1024 * 1024                     # conservative (v7x-sized) fallback
    # <= ~48 MiB on v7x (64 MiB/core), up to 96 MiB on v5e/v6e (128 MiB/core).
    return max(32 * 1024 * 1024, min((cap * 3) // 4, 96 * 1024 * 1024))


def _choose_batch_tile(B, D, width, x_itemsize, w_itemsize, vmem_limit, packed):
    # Total per-step footprint: 2x x tile (double buffer) + 2x W/bias (default
    # pipeline buffers) + ~10 f32 elementwise temporaries of the fused width.
    fixed = 2 * (D * width * w_itemsize + width * 4) + 2 * 8 * 128 * 4
    if packed:
        fixed += 3 * width * width * 4             # shift-matrix constants
    per_row = 2 * D * x_itemsize + 2 * 4 + 10 * width * 4
    budget = (vmem_limit * 4) // 5 - fixed
    bt = max(8, budget // per_row)
    bt = min(bt, 4096)
    # Guarantee >= 4 grid steps (>= 2 per TensorCore on v7x "parallel" sharding)
    if B >= 4 * 8:
        bt = min(bt, _round_up((B + 3) // 4, 8))
    bt = min(bt, _round_up(B, 8))
    return max(8, (bt // 8) * 8)


# --------------------------------------------------------------------------
# Loss wrapper
# --------------------------------------------------------------------------
def strict_imitation_nll_loss(x, y, params, lambda_c, *,
                              batch_tile=None, approx_softmax_recip=True):
    """Pallas implementation of StrictImitationNLLLoss.forward (reduction='mean')."""
    B, D = x.shape
    C, off2, width = params["n_classes"], params["off2"], params["width"]
    w_f, b_f = params["w"], params["b"]
    x_itemsize = jnp.dtype(x.dtype).itemsize
    w_itemsize = jnp.dtype(w_f.dtype).itemsize

    vmem_limit = _vmem_limit_bytes()
    if batch_tile is None:
        batch_tile = _choose_batch_tile(B, D, width, x_itemsize, w_itemsize,
                                        vmem_limit, params["packed"])
    else:
        batch_tile = max(8, _round_up(int(batch_tile), 8))
    b_rows = _round_up(B, batch_tile)
    num_tiles = b_rows // batch_tile

    # Only pad the batch when B is not a multiple of the tile; x stays in its
    # native dtype (cast to the matmul dtype inside the kernel).
    if b_rows != B:
        x_in = jnp.pad(x, ((0, b_rows - B), (0, 0)))
        y_in = jnp.pad(y.astype(jnp.int32), (0, b_rows - B), constant_values=-1)
    else:
        x_in = x
        y_in = y.astype(jnp.int32)
    y_in = y_in.reshape(b_rows, 1)

    kernel = functools.partial(_si_nll_kernel, n_classes=C, off2=off2,
                               lambda_c=float(lambda_c),
                               approx_recip=bool(approx_softmax_recip))

    cost = pl.CostEstimate(
        flops=2 * b_rows * D * width + 16 * b_rows * width,
        transcendentals=2 * b_rows * width + 2 * b_rows,
        bytes_accessed=(b_rows * D * x_itemsize + D * width * w_itemsize
                        + width * 4 + b_rows * 4 + num_tiles * 8 * 128 * 4))

    parts = pl.pallas_call(
        kernel,
        out_shape=jax.ShapeDtypeStruct((num_tiles, 8, 128), jnp.float32),
        grid_spec=pltpu.PrefetchScalarGridSpec(
            num_scalar_prefetch=0,
            grid=(num_tiles,),
            in_specs=[
                pl.BlockSpec((batch_tile, D), lambda i: (i, 0)),   # x tile (native dtype)
                pl.BlockSpec((D, width), lambda i: (0, 0)),        # fused W (grid invariant)
                pl.BlockSpec((1, width), lambda i: (0, 0)),        # fused bias
                pl.BlockSpec((batch_tile, 1), lambda i: (i, 0)),   # labels tile
            ],
            out_specs=pl.BlockSpec((1, 8, 128), lambda i: (i, 0, 0))),
        compiler_params=pltpu.CompilerParams(
            dimension_semantics=("parallel",),
            vmem_limit_bytes=int(vmem_limit)),
        cost_estimate=cost,
    )(x_in, w_f, b_f, y_in)

    # loss = nll_sum/B + lambda_c * diss_sum/B  (lambda_c already folded in-kernel)
    return jnp.sum(parts[:, 0, 0]) / float(B)


# --------------------------------------------------------------------------
# Pure-JAX reference (mirrors the PyTorch forward)
# --------------------------------------------------------------------------
def _reference_loss(x, y, w1, b1, w2, b2, lambda_c):
    B = x.shape[0]
    logits1 = x @ w1 + b1
    logits2 = x @ w2 + b2
    sm1 = jax.nn.softmax(logits1, axis=1)
    logsm1 = jax.nn.log_softmax(logits1, axis=1)
    logsm2 = jax.nn.log_softmax(logits2, axis=1)
    sm2 = jnp.exp(logsm2)
    correct = jnp.argmax(logsm1, axis=1) == y
    diss = jnp.sum(jnp.where(correct, jnp.sum(-sm1 * jnp.log(sm2), axis=1), 0.0))
    base = jnp.mean(-jnp.take_along_axis(logsm2, y[:, None], axis=1))
    return base + lambda_c * (1.0 / B) * diss


if __name__ == "__main__":
    # Small deterministic setup: batch=256, features=64, classes=16.
    B, D, C = 256, 64, 16
    lambda_c = 0.5

    key = jax.random.PRNGKey(0)
    kx, ky, k1w, k1b, k2w, k2b = jax.random.split(key, 6)

    x = jax.random.normal(kx, (B, D), dtype=jnp.float32)
    y = jax.random.randint(ky, (B,), 0, C, dtype=jnp.int32)

    # Deterministic synthetic parameters for h1 and h2 (dense classifiers).
    w1 = 0.1 * jax.random.normal(k1w, (D, C), dtype=jnp.float32)
    b1 = 0.1 * jax.random.normal(k1b, (1, C), dtype=jnp.float32)
    w2 = 0.1 * jax.random.normal(k2w, (D, C), dtype=jnp.float32)
    b2 = 0.1 * jax.random.normal(k2b, (1, C), dtype=jnp.float32)

    ref = _reference_loss(x, y, w1, b1, w2, b2, lambda_c)

    # Weight packing hoisted out of the per-call hot path (pack once, reuse).
    # f32 matmul path: tight check against the PyTorch-semantics reference.
    params_f32 = pack_si_params(w1, b1, w2, b2, matmul_dtype=jnp.float32)
    loss_f32 = jax.block_until_ready(
        strict_imitation_nll_loss(x, y, params_f32, lambda_c))
    assert jnp.allclose(loss_f32, ref, atol=5e-3, rtol=5e-3), (loss_f32, ref)

    # bf16 matmul path (f32 accumulation / f32 elementwise): looser tolerance,
    # since bf16 can flip the h1 argmax on near-tie rows (support-set change).
    params_bf16 = pack_si_params(w1, b1, w2, b2, matmul_dtype=jnp.bfloat16)
    loss_bf16 = jax.block_until_ready(
        strict_imitation_nll_loss(x, y, params_bf16, lambda_c))
    assert jnp.allclose(loss_bf16, ref, atol=5e-2, rtol=5e-2), (loss_bf16, ref)

    print("KERNEL_OK")
</pallas_src>

<mosaic_0001>
module attributes {stable_mosaic.version = 11 : i64} {
  func.func @_si_nll_kernel(%arg0: i32, %arg1: memref<64x64xf32, #tpu.memory_space<vmem>>, %arg2: memref<64x128xf32, #tpu.memory_space<vmem>>, %arg3: memref<1x128xf32, #tpu.memory_space<vmem>>, %arg4: memref<64x1xi32, #tpu.memory_space<vmem>>, %arg5: memref<1x8x128xf32, #tpu.memory_space<vmem>>) attributes {dimension_semantics = [#tpu.dimension_semantics<parallel>], iteration_bounds = array<i64: 4>, scalar_prefetch = 0 : i64, scratch_operands = 0 : i64, tpu.core_type = #tpu.core_type<tc>, window_params = [{transform_indices = @transform_0, window_bounds = array<i64: 64, 64>}, {pipeline_mode = #tpu.pipeline_mode<synchronous>, transform_indices = @transform_1, window_bounds = array<i64: 64, 128>}, {pipeline_mode = #tpu.pipeline_mode<synchronous>, transform_indices = @transform_2, window_bounds = array<i64: 1, 128>}, {transform_indices = @transform_3, window_bounds = array<i64: 64, 1>}, {transform_indices = @transform_4, window_bounds = array<i64: 1, 8, 128>}]} {
    %c0 = arith.constant 0 : index
    %c0_0 = arith.constant 0 : index
    %0 = vector.load %arg1[%c0, %c0_0] : memref<64x64xf32, #tpu.memory_space<vmem>>, vector<64x64xf32>
    %c0_1 = arith.constant 0 : index
    %c0_2 = arith.constant 0 : index
    %1 = vector.load %arg4[%c0_1, %c0_2] : memref<64x1xi32, #tpu.memory_space<vmem>>, vector<64x1xi32>
    %c0_3 = arith.constant 0 : index
    %c0_4 = arith.constant 0 : index
    %2 = vector.load %arg2[%c0_3, %c0_4] : memref<64x128xf32, #tpu.memory_space<vmem>>, vector<64x128xf32>
    %cst = arith.constant dense<0.000000e+00> : vector<64x128xf32>
    %3 = tpu.matmul %0, %2, %cst {dimension_numbers = #tpu.dot_dimension_numbers<[1], [0], [0], [1], [0, 0, 1, 1], [], []>} : vector<64x64xf32>, vector<64x128xf32>, vector<64x128xf32> -> vector<64x128xf32>
    %c0_5 = arith.constant 0 : index
    %c0_6 = arith.constant 0 : index
    %4 = vector.load %arg3[%c0_5, %c0_6] : memref<1x128xf32, #tpu.memory_space<vmem>>, vector<1x128xf32>
    %5 = vector.broadcast %4 : vector<1x128xf32> to vector<64x128xf32>
    %6 = arith.addf %3, %5 : vector<64x128xf32>
    %7 = tpu.iota {dimensions = array<i32: 1>} : vector<64x128xi32>
    %c16_i32 = arith.constant 16 : i32
    %8 = vector.broadcast %c16_i32 : i32 to vector<64x128xi32>
    %9 = arith.cmpi slt, %7, %8 : vector<64x128xi32>
    %c16_i32_7 = arith.constant 16 : i32
    %10 = vector.broadcast %c16_i32_7 : i32 to vector<64x128xi32>
    %11 = arith.cmpi sge, %7, %10 : vector<64x128xi32>
    %c32_i32 = arith.constant 32 : i32
    %12 = vector.broadcast %c32_i32 : i32 to vector<64x128xi32>
    %13 = arith.cmpi slt, %7, %12 : vector<64x128xi32>
    %14 = arith.andi %11, %13 : vector<64x128xi1>
    %cst_8 = arith.constant -1.000000e+30 : f32
    %15 = vector.broadcast %cst_8 : f32 to vector<64x128xf32>
    %16 = arith.select %9, %6, %15 : vector<64x128xi1>, vector<64x128xf32>
    %cst_9 = arith.constant -1.000000e+30 : f32
    %17 = vector.broadcast %cst_9 : f32 to vector<64x128xf32>
    %18 = arith.select %14, %6, %17 : vector<64x128xi1>, vector<64x128xf32>
    %cst_10 = arith.constant dense<0xFF800000> : vector<64xf32>
    %19 = vector.multi_reduction <maximumf>, %16, %cst_10 [1] : vector<64x128xf32> to vector<64xf32>
    %20 = vector.shape_cast %19 : vector<64xf32> to vector<64x1xf32>
    %21 = vector.broadcast %20 : vector<64x1xf32> to vector<64x128xf32>
    %22 = arith.subf %16, %21 : vector<64x128xf32>
    %23 = math.exp %22 : vector<64x128xf32>
    %cst_11 = arith.constant dense<0.000000e+00> : vector<64xf32>
    %24 = vector.multi_reduction <add>, %23, %cst_11 [1] : vector<64x128xf32> to vector<64xf32>
    %25 = vector.shape_cast %24 : vector<64xf32> to vector<64x1xf32>
    %26 = tpu.reciprocal %25 {approx = true} : vector<64x1xf32> -> vector<64x1xf32>
    %27 = vector.broadcast %26 : vector<64x1xf32> to vector<64x128xf32>
    %28 = arith.mulf %23, %27 : vector<64x128xf32>
    %cst_12 = arith.constant dense<0xFF800000> : vector<64xf32>
    %29 = vector.multi_reduction <maximumf>, %18, %cst_12 [1] : vector<64x128xf32> to vector<64xf32>
    %30 = vector.shape_cast %29 : vector<64xf32> to vector<64x1xf32>
    %31 = vector.broadcast %30 : vector<64x1xf32> to vector<64x128xf32>
    %32 = arith.subf %18, %31 : vector<64x128xf32>
    %33 = math.exp %32 : vector<64x128xf32>
    %cst_13 = arith.constant dense<0.000000e+00> : vector<64xf32>
    %34 = vector.multi_reduction <add>, %33, %cst_13 [1] : vector<64x128xf32> to vector<64xf32>
    %35 = vector.shape_cast %34 : vector<64xf32> to vector<64x1xf32>
    %36 = math.log %35 : vector<64x1xf32>
    %37 = vector.broadcast %36 : vector<64x1xf32> to vector<64x128xf32>
    %38 = arith.subf %32, %37 : vector<64x128xf32>
    %39 = vector.broadcast %20 : vector<64x1xf32> to vector<64x128xf32>
    %40 = arith.cmpf oge, %16, %39 : vector<64x128xf32>
    %c128_i32 = arith.constant 128 : i32
    %41 = vector.broadcast %c128_i32 : i32 to vector<64x128xi32>
    %42 = arith.select %40, %7, %41 : vector<64x128xi1>, vector<64x128xi32>
    %cst_14 = arith.constant dense<2147483647> : vector<64xi32>
    %43 = vector.multi_reduction <minsi>, %42, %cst_14 [1] : vector<64x128xi32> to vector<64xi32>
    %44 = vector.shape_cast %43 : vector<64xi32> to vector<64x1xi32>
    %45 = arith.cmpi eq, %44, %1 : vector<64x1xi32>
    %46 = arith.extui %45 : vector<64x1xi1> to vector<64x1xi32>
    %47 = arith.sitofp %46 : vector<64x1xi32> to vector<64x1xf32>
    %48 = tpu.iota {dimensions = array<i32: 0>} : vector<128x128xi32>
    %49 = tpu.iota {dimensions = array<i32: 1>} : vector<128x128xi32>
    %c16_i32_15 = arith.constant 16 : i32
    %50 = vector.broadcast %c16_i32_15 : i32 to vector<128x128xi32>
    %51 = arith.addi %48, %50 : vector<128x128xi32>
    %52 = arith.cmpi eq, %49, %51 : vector<128x128xi32>
    %c16_i32_16 = arith.constant 16 : i32
    %53 = vector.broadcast %c16_i32_16 : i32 to vector<128x128xi32>
    %54 = arith.cmpi slt, %48, %53 : vector<128x128xi32>
    %55 = arith.andi %52, %54 : vector<128x128xi1>
    %56 = arith.extui %55 : vector<128x128xi1> to vector<128x128xi32>
    %57 = arith.sitofp %56 : vector<128x128xi32> to vector<128x128xf32>
    %cst_17 = arith.constant dense<0.000000e+00> : vector<64x128xf32>
    %58 = tpu.matmul %28, %57, %cst_17 {dimension_numbers = #tpu.dot_dimension_numbers<[1], [0], [0], [1], [0, 0, 1, 1], [], []>} : vector<64x128xf32>, vector<128x128xf32>, vector<64x128xf32> -> vector<64x128xf32>
    %cst_18 = arith.constant 0.000000e+00 : f32
    %59 = vector.broadcast %cst_18 : f32 to vector<64x128xf32>
    %60 = arith.subf %59, %58 : vector<64x128xf32>
    %61 = arith.mulf %60, %38 : vector<64x128xf32>
    %cst_19 = arith.constant dense<0.000000e+00> : vector<64xf32>
    %62 = vector.multi_reduction <add>, %61, %cst_19 [1] : vector<64x128xf32> to vector<64xf32>
    %63 = vector.shape_cast %62 : vector<64xf32> to vector<64x1xf32>
    %64 = arith.mulf %47, %63 : vector<64x1xf32>
    %65 = vector.shape_cast %64 : vector<64x1xf32> to vector<1x64x1xf32>
    %cst_20 = arith.constant dense<0.000000e+00> : vector<1xf32>
    %66 = vector.multi_reduction <add>, %65, %cst_20 [1, 2] : vector<1x64x1xf32> to vector<1xf32>
    %67 = vector.shape_cast %66 : vector<1xf32> to vector<1x1x1xf32>
    %68 = vector.extract %67[0, 0, 0] : f32 from vector<1x1x1xf32>
    %c0_i32 = arith.constant 0 : i32
    %69 = vector.broadcast %c0_i32 : i32 to vector<64x1xi32>
    %70 = arith.cmpi sge, %1, %69 : vector<64x1xi32>
    %c16_i32_21 = arith.constant 16 : i32
    %71 = vector.broadcast %c16_i32_21 : i32 to vector<64x1xi32>
    %72 = arith.addi %1, %71 : vector<64x1xi32>
    %c-1_i32 = arith.constant -1 : i32
    %73 = vector.broadcast %c-1_i32 : i32 to vector<64x1xi32>
    %74 = arith.select %70, %72, %73 : vector<64x1xi1>, vector<64x1xi32>
    %75 = vector.broadcast %74 : vector<64x1xi32> to vector<64x128xi32>
    %76 = arith.cmpi eq, %7, %75 : vector<64x128xi32>
    %cst_22 = arith.constant 0.000000e+00 : f32
    %77 = vector.broadcast %cst_22 : f32 to vector<64x128xf32>
    %78 = arith.select %76, %38, %77 : vector<64x128xi1>, vector<64x128xf32>
    %79 = vector.shape_cast %78 : vector<64x128xf32> to vector<1x64x128xf32>
    %cst_23 = arith.constant dense<0.000000e+00> : vector<1xf32>
    %80 = vector.multi_reduction <add>, %79, %cst_23 [1, 2] : vector<1x64x128xf32> to vector<1xf32>
    %81 = vector.shape_cast %80 : vector<1xf32> to vector<1x1x1xf32>
    %82 = vector.extract %81[0, 0, 0] : f32 from vector<1x1x1xf32>
    %cst_24 = arith.constant 0.000000e+00 : f32
    %83 = arith.subf %cst_24, %82 : f32
    %cst_25 = arith.constant 5.000000e-01 : f32
    %84 = arith.mulf %cst_25, %68 : f32
    %85 = arith.addf %83, %84 : f32
    %86 = vector.broadcast %85 : f32 to vector<1x8x128xf32>
    %c0_26 = arith.constant 0 : index
    %c0_27 = arith.constant 0 : index
    %c0_28 = arith.constant 0 : index
    %87 = vector.load %arg5[%c0_26, %c0_27, %c0_28] : memref<1x8x128xf32, #tpu.memory_space<vmem>>, vector<1x8x128xf32>
    tpu.vector_store %arg5[%c0_26, %c0_27, %c0_28], %86 {strides = array<i32>} : memref<1x8x128xf32, #tpu.memory_space<vmem>>, vector<1x8x128xf32>,
    return
  }
  func.func @transform_0(%arg0: i32) -> (i32, i32) {
    %c0_i32 = arith.constant 0 : i32
    %c0_i32_0 = arith.constant 0 : i32
    return %arg0, %c0_i32 : i32, i32
  }
  func.func @transform_1(%arg0: i32) -> (i32, i32) {
    %c0_i32 = arith.constant 0 : i32
    %c0_i32_0 = arith.constant 0 : i32
    %c0_i32_1 = arith.constant 0 : i32
    return %c0_i32, %c0_i32_0 : i32, i32
  }
  func.func @transform_2(%arg0: i32) -> (i32, i32) {
    %c0_i32 = arith.constant 0 : i32
    %c0_i32_0 = arith.constant 0 : i32
    %c0_i32_1 = arith.constant 0 : i32
    return %c0_i32, %c0_i32_0 : i32, i32
  }
  func.func @transform_3(%arg0: i32) -> (i32, i32) {
    %c0_i32 = arith.constant 0 : i32
    %c0_i32_0 = arith.constant 0 : i32
    return %arg0, %c0_i32 : i32, i32
  }
  func.func @transform_4(%arg0: i32) -> (i32, i32, i32) {
    %c0_i32 = arith.constant 0 : i32
    %c0_i32_0 = arith.constant 0 : i32
    %c0_i32_1 = arith.constant 0 : i32
    return %arg0, %c0_i32, %c0_i32_0 : i32, i32, i32
  }
}

</mosaic_0001>

<bundles_post_ra>
// kernel: tpu_custom_call.1
= control target key start
LH: loop header
LB: loop body
LE: loop exit
PB: predicated region body
PF: predicated region fallthrough
CT: control target
= control target key end

     0   :  { %9 = vsyncpa [#allocation3], 0  ;;  %s2020_s0 = inlined_call_operand.vmem [shape: f32[256,64], index: 0, kind: input, shape index: {}]   ;;  %s2021_s1 = inlined_call_operand.vmem [shape: f32[64,128], index: 1, kind: input, shape index: {}]   ;;  %s2022_s2 = inlined_call_operand.vmem [shape: f32[1,128], index: 2, kind: input, shape index: {}]   ;;  %s2023_s3 = inlined_call_operand.vmem [shape: s32[256,1], index: 3, kind: input, shape index: {}]   ;;  %s2024_s4 = inlined_call_operand.hbm [shape: f32[4,8,128], index: 4, kind: output, shape index: {}]  }
   0x1   :  { %11 = vsyncpa [#allocation3 + $0x1], 0  ;;  %s1466_s15 = smov 0   ;;  %s1468_s16 = smov 0  }
   0x2   :  { %s1470_s17 = smov 0   ;;  %s1472_s18 = smov 0  }
   0x3 LB: > { %s1487_s19 = sadd.s32 4294967295, %s1435_s18   ;;  %s1159_s20 = sadd.s32 4294967294, %s1435_s18   ;;  %s1435_s18 = sphi %s1472_s18, %s2032_s18   ;;  %s1431_s17 = sphi %s1470_s17, %s2031_s17   ;;  %s1427_s16 = sphi %s1468_s16, %s2030_s16   ;;  %s1423_s15 = sphi %s1466_s15, %s2029_s15  }
   0x4   : > { %s1491_s21 = sadd.s32 1, %s1435_s18   ;;  %s118_s22 = sadd.s32 1, %s1431_s17 }
   0x5   : > { %s115_s23 = ssub.s32 %s1435_s18, %s1491_s21  ;;  %p128_p0 = scmp.ne.s32.totalorder %s1431_s17, %s1427_s16 }
   0x6   : > { %p116_p1 = scmp.eq.s32.totalorder %s115_s23, 0  ;;  %p129_p2 = scmp.eq.s32.totalorder %s1487_s19, 3 }
   0x7   : > { %p134_p3 = scmp.ne.s32.totalorder %s1427_s16, %s1423_s15  ;;  %p135_p4 = scmp.eq.s32.totalorder %s1159_s20, 3 }
   0x8   : > { %s1502_s24 = scalar_select %p116_p1, %s1431_s17, %s118_s22  }
   0x9   : > { %p1504_p5 = por %p129_p2, %p128_p0  ;;  %p1508_p6 = por %p135_p4, %p134_p3 }
   0xa   : > { %p1162_p7 = scmp.ge.s32.totalorder %s1435_s18, 1  ;;  %p177_p8 = scmp.lt.s32.totalorder %s1435_s18, 5 }
   0xc   : > { %p178_p9 = pnand %p1162_p7, %p177_p8 }
   0xd   : > { %s1164_s5 = sshll.u32 (!%p178_p9), %s1487_s19, 3  ;;  %s1190_s13 = sshll.u32 (!%p178_p9), %s1487_s19, 7 }
   0xe   : > { %181 = sbr.rel (%p178_p9) target bundleno = 1165 (0x48d), region = 36  ;;  %p209_p10 = scmp.lt.s32.totalorder (!%p178_p9), %s1164_s5, 31 }
   0xf   : > { %s1985_s6 = scalar_lea.hbm (!%p178_p9), %s2024_s4, %s1190_s13  ;;  %s1440_s19 = smov (!%p178_p9), [#allocation2]  }
  0x10   : > { %s1379_s9 = sshll.u32 (!%p178_p9), %s1440_s19, 4  ;;  %s1380_s9 = int_to_ptr.vmem [resolvable:$false] %s1379_s9 }
  0x13   : > { %v243_v0 = vld [vmem:[%s2021_s1 + $0x38] sm:$0xff]  ;;  %v242_v1 = vld [vmem:[%s2021_s1 + $0x30] sm:$0xff]  ;;  %v241_v2 = vld [vmem:[%s2021_s1 + $0x28] sm:$0xff]  ;;  %s2034_s5 = smov (!%p209_p10, %s1164_s5), 31  ;;  %vm251_vm0 = vcmask 523264   ;;  %v381_v16 = vlaneseq }
  0x14   : > { %1219 = vmatprep.subr.mxu0 %v243_v0  ;;  %v240_v3 = vld [vmem:[%s2021_s1 + $0x20] sm:$0xff]  ;;  %s1165_s10 = sshll.u32 %s2034_s5, 3  ;;  %v239_v4 = vld [vmem:[%s2021_s1 + $0x18] sm:$0xff]  ;;  %v238_v6 = vld [vmem:[%s2021_s1 + $0x10] sm:$0xff]  ;;  %s205_s5 = sand.u32 1, %s1427_s16  }
  0x15   : > { %1220 = vmatpush3.msra.mxu0 %v243_v0  ;;  %s212_s20 = scalar_lea.vmem %s2020_s0, %s1165_s10  ;;  %v237_v7 = vld [vmem:[%s2021_s1 + $0x8] sm:$0xff]  ;;  %v236_v8 = vld [vmem:[%s2021_s1] sm:$0xff]  ;;  %v1556_v18 = vand.u32 127, %v381_v16  ;;  %s1840_s11 = scalar_lea.vmem %s2023_s3, %s1165_s10 }
  0x16   : > { %1221 = vmatprep.subr.mxu0 %v242_v1  ;;  %v220_v5 = vld [vmem:[%s212_s20] sm:$0xff]  ;;  %v221_v9 = vld [vmem:[%s212_s20 + $0x8] sm:$0xff]  ;;  %v222_v10 = vld [vmem:[%s212_s20 + $0x10] sm:$0xff]  ;;  %s1163_s10 = sshll.u32 %s205_s5, 3  ;;  %s1075_s7 = scalar_lea.sflag [#allocation3], %s205_s5 }
  0x17   : > { %1222 = vmatpush3.msra.mxu0 %v242_v1  ;;  %1235 = vmatprep.mubr.msk.f32.mxu0 %vm251_vm0, %v220_v5  ;;  %v223_v11 = vld [vmem:[%s212_s20 + $0x18] sm:$0xff]  ;;  %v224_v12 = vld [vmem:[%s212_s20 + $0x20] sm:$0xff]  ;;  %v225_v13 = vld [vmem:[%s212_s20 + $0x28] sm:$0xff]  ;;  %vm383_vm1 = vcmp.lt.s32.totalorder %v1556_v18, 16  ;;  %vm384_vm2 = vcmp.ge.s32.totalorder %v1556_v18, 16  ;;  %vm385_vm3 = vcmp.lt.s32.totalorder %v1556_v18, 32 }
  0x18   : > { %1223 = vmatprep.subr.mxu0 %v241_v2  ;;  %v226_v14 = vld [vmem:[%s212_s20 + $0x30] sm:$0xff]  ;;  %v227_v15 = vld [vmem:[%s212_s20 + $0x38] sm:$0xff]  ;;  %v1168_v19 = vld [vmem:[%s2022_s2] ss:$0 sm:$0xff]  ;;  %s207_s20 = scalar_lea.vmem [#allocation2], %s1163_s10 }
  0x19   : > { %1224 = vmatpush3.msra.mxu0 %v241_v2  ;;  %vm1683_vm4 = vmand %vm384_vm2, %vm385_vm3  ;;  %s1088_s22 = sshll.u32 %s207_s20, 4  ;;  %s1089_s22 = int_to_ptr.vmem [resolvable:$true] %s1088_s22 }
  0x1a   : > { %1225 = vmatprep.subr.mxu0 %v240_v3  ;;  %s1375_s8 = scalar_lea.vmem %s1089_s22, 128  ;;  %p1382_p0 = scmp.lt.s32.totalorder %s1089_s22, %s1380_s9 }
  0x1b   : > { %1226 = vmatpush3.msra.mxu0 %v240_v3  ;;  %p1376_p11 = scmp.ne.s32.totalorder %s1089_s22, %s1375_s8 }
  0x1c   : > { %1227 = vmatprep.subr.mxu0 %v239_v4 }
  0x1d   : > { %1228 = vmatpush3.msra.mxu0 %v239_v4  ;;  %p1377_p12 = pnand %p1376_p11, %p1504_p5 }
  0x1e   : > { %1229 = vmatprep.subr.mxu0 %v238_v6 }
  0x1f   : > { %1230 = vmatpush3.msra.mxu0 %v238_v6  ;;  %p1378_p13 = pneg %p1377_p12 }
  0x20   : > { %1231 = vmatprep.subr.mxu0 %v237_v7 }
  0x21   : > { %1232 = vmatpush3.msra.mxu0 %v237_v7 }
  0x22   : > { %1233 = vmatprep.subr.mxu0 %v236_v8 }
  0x23   : > { %1234 = vmatpush3.msra.mxu0 %v236_v8 }
  0x24   : > { %1236 = vmatmul.mubr.msk.f32.vlgmr.msra.gmra.mxu0 %vm251_vm0, %v221_v9 }
  0x25   : > { %1238 = vmatprep.mubr.msk.f32.mxu0 %vm251_vm0, %v222_v10 }
  0x28   : > { %1239 = vmatmul.mubr.msk.f32.gmra.mxu0 %vm251_vm0, %v223_v11 }
  0x29   : > { %1241 = vmatprep.mubr.msk.f32.mxu0 %vm251_vm0, %v224_v12 }
  0x2c   : > { %1242 = vmatmul.mubr.msk.f32.gmra.mxu0 %vm251_vm0, %v225_v13 }
  0x2d   : > { %1244 = vmatprep.mubr.msk.f32.mxu0 %vm251_vm0, %v226_v14 }
  0x30   : > { %1245 = vmatmul.mubr.msk.f32.gmra.mxu0 %vm251_vm0, %v227_v15  ;;  %v708_v15 = vshrl.u32 %v381_v16, 7 }
  0xe4   : > { %v1237_v17 = vpop.f32.mrf.mxu0 }
  0xe5   : > { %v1564_v23 = vadd.f32 %v1237_v17, %v1168_v19  ;;  %v709_v17 = vadd.s32 8, %v708_v15 }
  0xe6   : > { %v342_v20 = vpop.f32.mrf.mxu0 }
  0xe7   : > { %v1561_v21 = vadd.f32 %v1168_v19, %v342_v20  ;;  %v1584_v30 = vsel %vm383_vm1, %v1564_v23, -1e+30  ;;  %v396_v13 = vsel %vm1683_vm4, %v1564_v23, -1e+30 }
  0xe8   : > { %v1240_v22 = vpop.f32.mrf.mxu0 }
  0xe9   : > { %v1569_v24 = vsel %vm383_vm1, %v1561_v21, -1e+30  ;;  %v1574_v28 = vadd.f32 %v1240_v22, %v1168_v19  ;;  %v395_v12 = vsel %vm1683_vm4, %v1561_v21, -1e+30  ;;  %v724_v21 = vadd.s32 16, %v709_v17 }
  0xea   : > { %v352_v25 = vpop.f32.mrf.mxu0  ;;  %403 = vmax.xlane.f32.xlu0 %v1569_v24  ;;  %v710_v22 = vadd.s32 16, %v708_v15 }
  0xeb   : > { %v1572_v26 = vadd.f32 %v1168_v19, %v352_v25  ;;  %v1595_v35 = vsel %vm383_vm1, %v1574_v28, -1e+30  ;;  %vm740_vm5 = vcmp.eq.s32.totalorder %v1556_v18, %v724_v21  ;;  %v1437_v25 = vmov 1.0  }
  0xec   : > { %v1243_v27 = vpop.f32.mrf.mxu0  ;;  %1247 = vmatprep.subr.msk.mxu1 %vm740_vm5, %v1437_v25  ;;  %vm739_vm6 = vcmp.eq.s32.totalorder %v1556_v18, %v710_v22 }
  0xed   : > { %v1579_v29 = vsel %vm383_vm1, %v1572_v26, -1e+30  ;;  %v1590_v34 = vadd.f32 %v1243_v27, %v1168_v19  ;;  %v397_v14 = vsel %vm1683_vm4, %v1572_v26, -1e+30  ;;  %1248 = vmatpush3.msk.msra.mxu1 %vm740_vm5, %v1437_v25  ;;  %v1438_v27 = vmov 0  }
  0xee   : > { %v362_v31 = vpop.f32.mrf.mxu0  ;;  %407 = vmax.xlane.f32.xlu1 %v1579_v29  ;;  %405 = vmax.xlane.f32.xlu0 %v1584_v30 }
  0xef   : > { %v1588_v32 = vadd.f32 %v1168_v19, %v362_v31  ;;  %v1611_v40 = vsel %vm383_vm1, %v1590_v34, -1e+30  ;;  %v1714_v16 = vsel %vm1683_vm4, %v1590_v34, -1e+30  ;;  %1249 = vmatprep.subr.msk.mxu1 %vm739_vm6, %v1437_v25  ;;  %1309 = vset.pattern.permute.xlu0 %v1438_v27 }
  0xf0   : > { %v1246_v33 = vpop.f32.mrf.mxu0  ;;  %1250 = vmatpush3.msk.msra.mxu1 %vm739_vm6, %v1437_v25  ;;  %1310 = vset.pattern.permute.xlu1 %v1438_v27 }
  0xf1   : > { %v1600_v36 = vsel %vm383_vm1, %v1588_v32, -1e+30  ;;  %v1606_v39 = vadd.f32 %v1246_v33, %v1168_v19  ;;  %v1706_v20 = vsel %vm1683_vm4, %v1588_v32, -1e+30 }
  0xf2   : > { %v372_v37 = vpop.f32.mrf.mxu0  ;;  %409 = vmax.xlane.f32.xlu1 %v1595_v35  ;;  %411 = vmax.xlane.f32.xlu0 %v1600_v36 }
  0xf3   : > { %v1604_v38 = vadd.f32 %v1168_v19, %v372_v37  ;;  %v1623_v42 = vsel %vm383_vm1, %v1606_v39, -1e+30  ;;  %v1701_v19 = vsel %vm1683_vm4, %v1574_v28, -1e+30  ;;  %v1727_v26 = vsel %vm1683_vm4, %v1606_v39, -1e+30 }
  0xf5   : > { %v1616_v41 = vsel %vm383_vm1, %v1604_v38, -1e+30  ;;  %v1719_v23 = vsel %vm1683_vm4, %v1604_v38, -1e+30 }
  0xf6   : > { %413 = vmax.xlane.f32.xlu1 %v1611_v40  ;;  %415 = vmax.xlane.f32.xlu0 %v1616_v41 }
  0xfa   : > { %417 = vmax.xlane.f32.xlu1 %v1623_v42 }
 0x173   : > { %v1626_v43 = vpop.xlane.xlu0 %403 }
 0x174   : > { %v419_v44 = vsub.f32 %v1569_v24, %v1626_v43  ;;  %vm555_vm7 = vcmp.ge.f32.partialorder %v1569_v24, %v1626_v43 }
 0x176   : > { %v427_v45 = vmul.f32 1.442695, %v419_v44 }
 0x177   : > { %v1630_v46 = vpop.xlane.xlu1 %407  ;;  %v1632_v47 = vpop.xlane.xlu0 %405 }
 0x178   : > { %1311 = vpow2.f32 %v427_v45  ;;  %v421_v48 = vsub.f32 %v1579_v29, %v1630_v46  ;;  %v420_v49 = vsub.f32 %v1584_v30, %v1632_v47  ;;  %vm557_vm8 = vcmp.ge.f32.partialorder %v1579_v29, %v1630_v46 }
 0x179   : > { %vm556_vm9 = vcmp.ge.f32.partialorder %v1584_v30, %v1632_v47 }
 0x17a   : > { %v431_v50 = vmul.f32 1.442695, %v421_v48  ;;  %v429_v51 = vmul.f32 1.442695, %v420_v49  ;;  %v1779_v43 = vsel %vm556_vm9, %v1556_v18, 128 }
 0x17b   : > { %v1638_v52 = vpop.xlane.xlu1 %409  ;;  %v1640_v53 = vpop.xlane.xlu0 %411  ;;  %v586_v30 = vshra.s32 %v1779_v43, 16 }
 0x17c   : > { %1313 = vpow2.f32 %v431_v50  ;;  %v422_v54 = vsub.f32 %v1595_v35, %v1638_v52  ;;  %v423_v55 = vsub.f32 %v1600_v36, %v1640_v53  ;;  %vm559_vm10 = vcmp.ge.f32.partialorder %v1600_v36, %v1640_v53 }
 0x17d   : > { %1315 = vpow2.f32 %v429_v51  ;;  %vm558_vm11 = vcmp.ge.f32.partialorder %v1595_v35, %v1638_v52 }
 0x17e   : > { %v433_v56 = vmul.f32 1.442695, %v422_v54  ;;  %v435_v57 = vmul.f32 1.442695, %v423_v55  ;;  %v1794_v47 = vsel %vm558_vm11, %v1556_v18, 128 }
 0x17f   : > { %v1646_v58 = vpop.xlane.xlu1 %413  ;;  %v1648_v59 = vpop.xlane.xlu0 %415  ;;  %v614_v52 = vshra.s32 %v1794_v47, 16 }
 0x180   : > { %1317 = vpow2.f32 %v433_v56  ;;  %v424_v60 = vsub.f32 %v1611_v40, %v1646_v58  ;;  %v425_v61 = vsub.f32 %v1616_v41, %v1648_v59  ;;  %vm561_vm12 = vcmp.ge.f32.partialorder %v1616_v41, %v1648_v59 }
 0x181   : > { %1319 = vpow2.f32 %v435_v57  ;;  %vm560_vm13 = vcmp.ge.f32.partialorder %v1611_v40, %v1646_v58  ;;  %v1802_v35 = vsel %vm561_vm12, %v1556_v18, 128  ;;  %v1805_v41 = vcvt.s32.f32 %v586_v30 }
 0x182   : > { %v437_v62 = vmul.f32 1.442695, %v424_v60  ;;  %v439_v63 = vmul.f32 1.442695, %v425_v61  ;;  %v1809_v59 = vsel %vm560_vm13, %v1556_v18, 128  ;;  %v1818_v40 = vcvt.s32.f32 %v614_v52 }
 0x183   : > { %v1654_v0 = vpop.xlane.xlu1 %417  ;;  %v642_v58 = vshra.s32 %v1809_v59, 16 }
 0x184   : > { %1321 = vpow2.f32 %v437_v62  ;;  %v426_v1 = vsub.f32 %v1623_v42, %v1654_v0  ;;  %vm562_vm14 = vcmp.ge.f32.partialorder %v1623_v42, %v1654_v0 }
 0x185   : > { %v1658_v2 = vpop.eup %1311  ;;  %1323 = vpow2.f32 %v439_v63 }
 0x186   : > { %v441_v3 = vmul.f32 1.442695, %v426_v1  ;;  %443 = vadd.xlane.f32.xlu0 %v1658_v2 }
 0x188   : > { %1325 = vpow2.f32 %v441_v3 }
 0x189   : > { %v1661_v4 = vpop.eup %1313 }
 0x18a   : > { %v1663_v5 = vpop.eup %1315  ;;  %447 = vadd.xlane.f32.xlu0 %v1661_v4 }
 0x18b   : > { %445 = vadd.xlane.f32.xlu1 %v1663_v5 }
 0x18d   : > { %v1667_v6 = vpop.eup %1317 }
 0x18e   : > { %v1669_v7 = vpop.eup %1319 }
 0x18f   : > { %449 = vadd.xlane.f32.xlu1 %v1667_v6  ;;  %451 = vadd.xlane.f32.xlu0 %v1669_v7 }
 0x191   : > { %v1673_v8 = vpop.eup %1321 }
 0x192   : > { %v1675_v9 = vpop.eup %1323 }
 0x193   : > { %453 = vadd.xlane.f32.xlu1 %v1673_v8  ;;  %455 = vadd.xlane.f32.xlu0 %v1675_v9 }
 0x195   : > { %v1681_v10 = vpop.eup %1325 }
 0x197   : > { %457 = vadd.xlane.f32.xlu1 %v1681_v10  ;;  %475 = vmax.xlane.f32.xlu0 %v395_v12 }
 0x19b   : > { %477 = vmax.xlane.f32.xlu1 %v396_v13  ;;  %479 = vmax.xlane.f32.xlu0 %v397_v14 }
 0x19f   : > { %481 = vmax.xlane.f32.xlu1 %v1701_v19  ;;  %483 = vmax.xlane.f32.xlu0 %v1706_v20 }
 0x1a3   : > { %485 = vmax.xlane.f32.xlu1 %v1714_v16  ;;  %487 = vmax.xlane.f32.xlu0 %v1719_v23 }
 0x1a7   : > { %489 = vmax.xlane.f32.xlu1 %v1727_v26 }
 0x20f   : > { %v444_v28 = vpop.xlane.xlu0 %443 }
 0x210   : > { %1327 = vrcp.f32 %v444_v28 }
 0x213   : > { %v448_v31 = vpop.xlane.xlu0 %447 }
 0x214   : > { %v446_v32 = vpop.xlane.xlu1 %445  ;;  %1329 = vrcp.f32 %v448_v31 }
 0x215   : > { %1331 = vrcp.f32 %v446_v32 }
 0x218   : > { %v450_v33 = vpop.xlane.xlu1 %449  ;;  %v452_v34 = vpop.xlane.xlu0 %451 }
 0x219   : > { %1333 = vrcp.f32 %v450_v33 }
 0x21a   : > { %1335 = vrcp.f32 %v452_v34  ;;  %v1766_v34 = vsel %vm555_vm7, %v1556_v18, 128 }
 0x21c   : > { %v454_v37 = vpop.xlane.xlu1 %453  ;;  %v456_v38 = vpop.xlane.xlu0 %455 }
 0x21d   : > { %v1328_v39 = vpop.eup %1327  ;;  %1337 = vrcp.f32 %v454_v37 }
 0x21e   : > { %1339 = vrcp.f32 %v456_v38  ;;  %v467_v44 = vmul.f32 %v1328_v39, %v1658_v2  ;;  %v1772_v38 = vsel %vm557_vm8, %v1556_v18, 128  ;;  %v1787_v39 = vsel %vm559_vm10, %v1556_v18, 128 }
 0x21f   : > { %v600_v46 = vshra.s32 %v1772_v38, 16 }
 0x220   : > { %v458_v45 = vpop.xlane.xlu1 %457  ;;  %v476_v48 = vpop.xlane.xlu0 %475  ;;  %1251 = vmatprep.mubr.f32.mxu1 %v467_v44  ;;  %v628_v44 = vshra.s32 %v1787_v39, 16 }
 0x221   : > { %v1330_v49 = vpop.eup %1329  ;;  %1341 = vrcp.f32 %v458_v45  ;;  %v1731_v50 = vsub.f32 %v395_v12, %v476_v48  ;;  %v1796_v53 = vcvt.s32.f32 %v600_v46  ;;  %v656_v48 = vshra.s32 %v1802_v35, 16 }
 0x222   : > { %v1332_v51 = vpop.eup %1331  ;;  %v469_v54 = vmul.f32 %v1330_v49, %v1661_v4  ;;  %v1811_v45 = vcvt.s32.f32 %v628_v44  ;;  %v1822_v49 = vsel %vm562_vm14, %v1556_v18, 128 }
 0x223   : > { %v499_v55 = vmul.f32 1.442695, %v1731_v50  ;;  %v468_v56 = vmul.f32 %v1332_v51, %v1663_v5  ;;  %v1824_v51 = vcvt.s32.f32 %v656_v48  ;;  %v670_v42 = vshra.s32 %v1822_v49, 16 }
 0x224   : > { %v478_v57 = vpop.xlane.xlu1 %477  ;;  %v480_v60 = vpop.xlane.xlu0 %479 }
 0x225   : > { %1343 = vpow2.f32 %v499_v55  ;;  %v1736_v61 = vsub.f32 %v396_v13, %v478_v57  ;;  %v1738_v62 = vsub.f32 %v397_v14, %v480_v60  ;;  %1252 = vmatmul.mubr.f32.vlgmr.msra.gmra.mxu1 %v468_v56  ;;  %v1832_v0 = vcvt.s32.f32 %v670_v42  ;;  %v1843_v55 = vld [vmem:[%s1840_s11] sm:$0xff]  ;;  %v1846_v56 = vld [vmem:[%s1840_s11 + $0x8] sm:$0xff] }
 0x226   : > { %v1334_v63 = vpop.eup %1333  ;;  %1254 = vmatprep.mubr.f32.mxu1 %v469_v54  ;;  %v1828_v54 = vcvt.s32.f32 %v642_v58  ;;  %v997_v57 = vadd.s32 16, %v1843_v55  ;;  %vm989_vm15 = vcmp.ge.s32.totalorder %v1843_v55, 0  ;;  %v998_v60 = vadd.s32 16, %v1846_v56 }
 0x227   : > { %v1336_v1 = vpop.eup %1335  ;;  %v501_v2 = vmul.f32 1.442695, %v1736_v61  ;;  %v503_v3 = vmul.f32 1.442695, %v1738_v62  ;;  %v470_v4 = vmul.f32 %v1334_v63, %v1667_v6  ;;  %vm990_vm0 = vcmp.ge.s32.totalorder %v1846_v56, 0  ;;  %v1853_v63 = vld [vmem:[%s1840_s11 + $0x18] sm:$0xff] }
 0x228   : > { %v482_v11 = vpop.xlane.xlu1 %481  ;;  %v484_v12 = vpop.xlane.xlu0 %483  ;;  %v471_v5 = vmul.f32 %v1336_v1, %v1669_v7  ;;  %v1005_v1 = vsel %vm989_vm15, %v997_v57, 4294967295  ;;  %vm992_vm1 = vcmp.ge.s32.totalorder %v1853_v63, 0 }
 0x229   : > { %1345 = vpow2.f32 %v501_v2  ;;  %v1745_v13 = vsub.f32 %v1701_v19, %v482_v11  ;;  %v1748_v14 = vsub.f32 %v1706_v20, %v484_v12  ;;  %1255 = vmatmul.mubr.f32.gmra.mxu1 %v470_v4  ;;  %v1006_v2 = vsel %vm990_vm0, %v998_v60, 4294967295  ;;  %v1858_v4 = vld [vmem:[%s1840_s11 + $0x20] sm:$0xff] }
 0x22a   : > { %v1338_v15 = vpop.eup %1337  ;;  %1347 = vpow2.f32 %v503_v3  ;;  %1257 = vmatprep.mubr.f32.mxu1 %v471_v5  ;;  %v1000_v3 = vadd.s32 16, %v1853_v63  ;;  %v1001_v12 = vadd.s32 16, %v1858_v4  ;;  %vm993_vm2 = vcmp.ge.s32.totalorder %v1858_v4, 0  ;;  %v1863_v5 = vld [vmem:[%s1840_s11 + $0x28] sm:$0xff] }
 0x22b   : > { %v1340_v17 = vpop.eup %1339  ;;  %v505_v21 = vmul.f32 1.442695, %v1745_v13  ;;  %v507_v6 = vmul.f32 1.442695, %v1748_v14  ;;  %v472_v22 = vmul.f32 %v1338_v15, %v1673_v8  ;;  %vm994_vm3 = vcmp.ge.s32.totalorder %v1863_v5, 0 }
 0x22c   : > { %v486_v25 = vpop.xlane.xlu1 %485  ;;  %v473_v7 = vmul.f32 %v1340_v17, %v1675_v9  ;;  %v1008_v11 = vsel %vm992_vm1, %v1000_v3, 4294967295  ;;  %v488_v15 = vpop.xlane.xlu0 %487  ;;  %v1009_v17 = vsel %vm993_vm2, %v1001_v12, 4294967295 }
 0x22d   : > { %1349 = vpow2.f32 %v505_v21  ;;  %v1755_v19 = vsub.f32 %v1714_v16, %v486_v25  ;;  %1258 = vmatmul.mubr.f32.gmra.mxu1 %v472_v22  ;;  %v1002_v21 = vadd.s32 16, %v1863_v5 }
 0x22e   : > { %v1342_v20 = vpop.eup %1341  ;;  %1351 = vpow2.f32 %v507_v6  ;;  %1260 = vmatprep.mubr.f32.mxu1 %v473_v7  ;;  %v1868_v6 = vsub.f32 %v1719_v23, %v488_v15 }
 0x22f   : > { %v509_v27 = vmul.f32 1.442695, %v1755_v19  ;;  %v474_v28 = vmul.f32 %v1342_v20, %v1681_v10  ;;  %v1010_v22 = vsel %vm994_vm3, %v1002_v21, 4294967295  ;;  %v1872_v20 = vld [vmem:[%s1840_s11 + $0x10] sm:$0xff] }
 0x230   : > { %v490_v31 = vpop.xlane.xlu1 %489  ;;  %v511_v25 = vmul.f32 1.442695, %v1868_v6  ;;  %vm991_vm4 = vcmp.ge.s32.totalorder %v1872_v20, 0 }
 0x231   : > { %1353 = vpow2.f32 %v509_v27  ;;  %v1760_v32 = vsub.f32 %v1727_v26, %v490_v31  ;;  %1261 = vmatmul.mubr.f32.gmra.mxu1 %v474_v28  ;;  %v572_v26 = vshra.s32 %v1766_v34, 16  ;;  %v999_v27 = vadd.s32 16, %v1872_v20 }
 0x232   : > { %v1344_v8 = vpop.eup %1343 }
 0x233   : > { %v513_v9 = vmul.f32 1.442695, %v1760_v32  ;;  %515 = vadd.xlane.f32.xlu0 %v1344_v8  ;;  %v1781_v29 = vcvt.s32.f32 %v572_v26  ;;  %v1007_v28 = vsel %vm991_vm4, %v999_v27, 4294967295 }
 0x235   : > { %1355 = vpow2.f32 %v513_v9 }
 0x236   : > { %v1346_v16 = vpop.eup %1345  ;;  %1357 = vpow2.f32 %v511_v25 }
 0x237   : > { %v1348_v33 = vpop.eup %1347  ;;  %517 = vadd.xlane.f32.xlu1 %v1346_v16 }
 0x238   : > { %519 = vadd.xlane.f32.xlu0 %v1348_v33  ;;  %v571_v33 = vand.u32 65535, %v1766_v34  ;;  %v627_v34 = vand.u32 65535, %v1787_v39 }
 0x23a   : > { %v1350_v10 = vpop.eup %1349 }
 0x23b   : > { %v1352_v37 = vpop.eup %1351  ;;  %521 = vadd.xlane.f32.xlu1 %v1350_v10 }
 0x23c   : > { %523 = vadd.xlane.f32.xlu0 %v1352_v37  ;;  %v573_v37 = vcvt.s32.f32 %v571_v33 }
 0x23e   : > { %v1354_v24 = vpop.eup %1353 }
 0x23f   : > { %525 = vadd.xlane.f32.xlu1 %v1354_v24  ;;  %v599_v24 = vand.u32 65535, %v1772_v38 }
 0x240   : > { %575 = vmin.xlane.f32.xlu0 %v1781_v29 }
 0x241   : > { %v601_v52 = vcvt.s32.f32 %v599_v24 }
 0x242   : > { %v1356_v36 = vpop.eup %1355 }
 0x243   : > { %529 = vadd.xlane.f32.xlu1 %v1356_v36  ;;  %v1358_v7 = vpop.eup %1357  ;;  %v585_v36 = vand.u32 65535, %v1779_v43  ;;  %v629_v43 = vcvt.s32.f32 %v627_v34 }
 0x244   : > { %603 = vmin.xlane.f32.xlu0 %v1796_v53 }
 0x245   : > { %v587_v58 = vcvt.s32.f32 %v585_v36 }
 0x247   : > { %589 = vmin.xlane.f32.xlu1 %v1805_v41 }
 0x248   : > { %631 = vmin.xlane.f32.xlu0 %v1811_v45 }
 0x24b   : > { %617 = vmin.xlane.f32.xlu1 %v1818_v40 }
 0x24c   : > { %659 = vmin.xlane.f32.xlu0 %v1824_v51 }
 0x24f   : > { %645 = vmin.xlane.f32.xlu1 %v1828_v54 }
 0x253   : > { %673 = vmin.xlane.f32.xlu1 %v1832_v0 }
 0x262   : > { %1014 = vperm.xlu0 %1309, %v1005_v1   ;;  %v641_v1 = vand.u32 65535, %v1809_v59 }
 0x264   : > { %1017 = vperm.xlu1 %1310, %v1006_v2   ;;  %v643_v3 = vcvt.s32.f32 %v641_v1 }
 0x268   : > { %1023 = vperm.xlu1 %1310, %v1008_v11  }
 0x26c   : > { %1026 = vperm.xlu1 %1310, %v1009_v17  }
 0x270   : > { %1029 = vperm.xlu1 %1310, %v1010_v22   ;;  %v655_v22 = vand.u32 65535, %v1802_v35 }
 0x281   : > { %527 = vadd.xlane.f32.xlu0 %v1358_v7 }
 0x297   : > { %1020 = vperm.xlu0 %1309, %v1007_v28  }
 0x2bc   : > { %v516_v31 = vpop.xlane.xlu0 %515 }
 0x2bd   : > { %1359 = vlog2.f32 %v516_v31  ;;  %v657_v31 = vcvt.s32.f32 %v655_v22 }
 0x2c0   : > { %v518_v8 = vpop.xlane.xlu1 %517 }
 0x2c1   : > { %v520_v23 = vpop.xlane.xlu0 %519  ;;  %1361 = vlog2.f32 %v518_v8 }
 0x2c4   : > { %v522_v9 = vpop.xlane.xlu1 %521 }
 0x2c5   : > { %v524_v16 = vpop.xlane.xlu0 %523  ;;  %1363 = vlog2.f32 %v522_v9 }
 0x2c6   : > { %1365 = vlog2.f32 %v520_v23 }
 0x2c8   : > { %v526_v10 = vpop.xlane.xlu1 %525 }
 0x2c9   : > { %v1877_v26 = vpop.xlane.xlu0 %575  ;;  %1367 = vlog2.f32 %v526_v10 }
 0x2ca   : > { %vm577_vm5 = vcmp.eq.f32.partialorder %v1781_v29, %v1877_v26  ;;  %v613_v29 = vand.u32 65535, %v1794_v47  ;;  %v1360_v47 = vpop.eup %1359  ;;  %1369 = vlog2.f32 %v524_v16 }
 0x2cb   : > { %v578_v46 = vsel %vm577_vm5, %v573_v37, inf  ;;  %v532_v12 = vmul.f32 0.6931472, %v1360_v47 }
 0x2cc   : > { %579 = vmin.xlane.f32.xlu0 %v578_v46  ;;  %v530_v30 = vpop.xlane.xlu1 %529  ;;  %v615_v60 = vcvt.s32.f32 %v613_v29 }
 0x2cd   : > { %v1883_v44 = vpop.xlane.xlu0 %603  ;;  %v547_v25 = vsub.f32 %v1731_v50, %v532_v12  ;;  %1371 = vlog2.f32 %v530_v30 }
 0x2ce   : > { %vm605_vm6 = vcmp.eq.f32.partialorder %v1796_v53, %v1883_v44  ;;  %v1362_v11 = vpop.eup %1361 }
 0x2cf   : > { %v606_v48 = vsel %vm605_vm6, %v601_v52, inf }
 0x2d0   : > { %607 = vmin.xlane.f32.xlu0 %v606_v48  ;;  %v1888_v38 = vpop.xlane.xlu1 %589 }
 0x2d1   : > { %v1891_v42 = vpop.xlane.xlu0 %631  ;;  %vm591_vm7 = vcmp.eq.f32.partialorder %v1805_v41, %v1888_v38 }
 0x2d2   : > { %v592_v57 = vsel %vm591_vm7, %v587_v58, inf  ;;  %vm633_vm8 = vcmp.eq.f32.partialorder %v1811_v45, %v1891_v42  ;;  %v669_v45 = vand.u32 65535, %v1822_v49  ;;  %v1364_v8 = vpop.eup %1363  ;;  %vm964_vm7 = vcmask 7168  }
 0x2d3   : > { %593 = vmin.xlane.f32.xlu1 %v592_v57  ;;  %v634_v39 = vsel %vm633_vm8, %v629_v43, inf  ;;  %v1366_v9 = vpop.eup %1365  ;;  %v538_v16 = vmul.f32 0.6931472, %v1364_v8 }
 0x2d4   : > { %635 = vmin.xlane.f32.xlu0 %v634_v39  ;;  %v1897_v53 = vpop.xlane.xlu1 %617  ;;  %v671_v21 = vcvt.s32.f32 %v669_v45  ;;  %v536_v46 = vmul.f32 0.6931472, %v1366_v9 }
 0x2d5   : > { %vm619_vm9 = vcmp.eq.f32.partialorder %v1818_v40, %v1897_v53  ;;  %v1905_v15 = vpop.xlane.xlu0 %659  ;;  %v534_v40 = vmul.f32 0.6931472, %v1362_v11  ;;  %v550_v52 = vsub.f32 %v1745_v13, %v538_v16 }
 0x2d6   : > { %v620_v2 = vsel %vm619_vm9, %v615_v60, inf  ;;  %vm661_vm13 = vcmp.eq.f32.partialorder %v1824_v51, %v1905_v15  ;;  %v1368_v10 = vpop.eup %1367  ;;  %v549_v47 = vsub.f32 %v1738_v62, %v536_v46 }
 0x2d7   : > { %621 = vmin.xlane.f32.xlu1 %v620_v2  ;;  %v548_v27 = vsub.f32 %v1736_v61, %v534_v40  ;;  %v662_v35 = vsel %vm661_vm13, %v657_v31, inf  ;;  %v542_v36 = vmul.f32 0.6931472, %v1368_v10  ;;  %v1370_v48 = vpop.eup %1369 }
 0x2d8   : > { %v1902_v41 = vpop.xlane.xlu1 %645  ;;  %v540_v39 = vmul.f32 0.6931472, %v1370_v48 }
 0x2d9   : > { %vm647_vm10 = vcmp.eq.f32.partialorder %v1828_v54, %v1902_v41  ;;  %v552_v60 = vsub.f32 %v1755_v19, %v542_v36 }
 0x2da   : > { %v648_v59 = vsel %vm647_vm10, %v643_v3, inf  ;;  %v1372_v2 = vpop.eup %1371  ;;  %v551_v40 = vsub.f32 %v1748_v14, %v540_v39 }
 0x2db   : > { %649 = vmin.xlane.f32.xlu1 %v648_v59  ;;  %v546_v59 = vmul.f32 0.6931472, %v1372_v2 }
 0x2dc   : > { %v1909_v17 = vpop.xlane.xlu1 %673 }
 0x2dd   : > { %v1015_v49 = vpop.permute.xlu0 %1014  ;;  %vm675_vm11 = vcmp.eq.f32.partialorder %v1832_v0, %v1909_v17  ;;  %v1925_v19 = vsub.f32 %v1760_v32, %v546_v59 }
 0x2de   : > { %vm1037_vm12 = vcmp.eq.s32.totalorder %v1556_v18, %v1015_v49  ;;  %v676_v7 = vsel %vm675_vm11, %v671_v21, inf }
 0x2df   : > { %v1045_v54 = vsel %vm1037_vm12, %v547_v25, 0.0  ;;  %677 = vmin.xlane.f32.xlu1 %v676_v7 }
 0x2e0   : > { %v1018_v28 = vpop.permute.xlu1 %1017 }
 0x2e1   : > { %vm1038_vm14 = vcmp.eq.s32.totalorder %v1556_v18, %v1018_v28 }
 0x2e2   : > { %v1046_v50 = vsel %vm1038_vm14, %v548_v27, 0.0 }
 0x2e3   : > { %v1053_v0 = vadd.f32 %v1046_v50, %v1045_v54  ;;  %663 = vmin.xlane.f32.xlu1 %v662_v35 }
 0x2e4   : > { %v1024_v49 = vpop.permute.xlu1 %1023 }
 0x2e5   : > { %v1253_v23 = vpop.f32.mrf.mxu1  ;;  %vm1040_vm0 = vcmp.eq.s32.totalorder %v1556_v18, %v1024_v49 }
 0x2e6   : > { %v925_v33 = vsub.f32 0.0, %v1253_v23  ;;  %v1048_v35 = vsel %vm1040_vm0, %v550_v52, 0.0 }
 0x2e7   : > { %v885_v37 = vpop.f32.mrf.mxu1 }
 0x2e8   : > { %v924_v24 = vsub.f32 0.0, %v885_v37  ;;  %v933_v51 = vmul.f32 %v925_v33, %v548_v27  ;;  %v1027_v27 = vpop.permute.xlu1 %1026 }
 0x2e9   : > { %v1256_v61 = vpop.f32.mrf.mxu1  ;;  %vm1041_vm2 = vcmp.eq.s32.totalorder %v1556_v18, %v1027_v27 }
 0x2ea   : > { %v927_v34 = vsub.f32 0.0, %v1256_v61  ;;  %942 = vadd.xlane.f32.xlu0 %v933_v51  ;;  %v932_v30 = vmul.f32 %v924_v24, %v547_v25  ;;  %v1929_v25 = vld [vmem:[%s1840_s11 + $0x38] sm:$0xff]  ;;  %v1049_v9 = vsel %vm1041_vm2, %v551_v40, 0.0 }
 0x2eb   : > { %v895_v58 = vpop.f32.mrf.mxu1  ;;  %v1004_v7 = vadd.s32 16, %v1929_v25  ;;  %vm996_vm15 = vcmp.ge.s32.totalorder %v1929_v25, 0 }
 0x2ec   : > { %v926_v29 = vsub.f32 0.0, %v895_v58  ;;  %940 = vadd.xlane.f32.xlu1 %v932_v30  ;;  %v935_v43 = vmul.f32 %v927_v34, %v550_v52  ;;  %v1030_v32 = vpop.permute.xlu1 %1029 }
 0x2ed   : > { %v1259_v57 = vpop.f32.mrf.mxu1  ;;  %v1012_v14 = vsel %vm996_vm15, %v1004_v7, 4294967295  ;;  %vm1042_vm3 = vcmp.eq.s32.totalorder %v1556_v18, %v1030_v32 }
 0x2ee   : > { %v929_v1 = vsub.f32 0.0, %v1259_v57  ;;  %946 = vadd.xlane.f32.xlu0 %v935_v43  ;;  %v934_v45 = vmul.f32 %v926_v29, %v549_v47  ;;  %v1050_v37 = vsel %vm1042_vm3, %v552_v60, 0.0  ;;  %v582_v29 = vcvt.f32.s32 %v1877_v26 }
 0x2ef   : > { %v905_v3 = vpop.f32.mrf.mxu1  ;;  %v638_v26 = vcvt.f32.s32 %v1891_v42 }
 0x2f0   : > { %v928_v13 = vsub.f32 0.0, %v905_v3  ;;  %v937_v11 = vmul.f32 %v929_v1, %v552_v60  ;;  %v610_v3 = vcvt.f32.s32 %v1883_v44  ;;  %v1439_v44 = vmov 0.0  }
 0x2f1   : > { %v1262_v12 = vpop.f32.mrf.mxu1 }
 0x2f2   : > { %944 = vadd.xlane.f32.xlu0 %v934_v45  ;;  %950 = vadd.xlane.f32.xlu1 %v937_v11  ;;  %v931_v21 = vsub.f32 0.0, %v1262_v12  ;;  %v936_v22 = vmul.f32 %v928_v13, %v551_v40  ;;  %v624_v13 = vcvt.f32.s32 %v1897_v53 }
 0x2f3   : > { %v915_v16 = vpop.f32.mrf.mxu1 }
 0x2f4   : > { %v939_v62 = vmul.f32 %v931_v21, %v1925_v19  ;;  %v930_v24 = vsub.f32 0.0, %v915_v16  ;;  %v625_v21 = vshll.u32 %v624_v13, 16 }
 0x2f6   : > { %948 = vadd.xlane.f32.xlu0 %v936_v22  ;;  %v652_v22 = vcvt.f32.s32 %v1902_v41 }
 0x2fa   : > { %954 = vadd.xlane.f32.xlu0 %v939_v62 }
 0x30a   : > { %v528_v54 = vpop.xlane.xlu0 %527 }
 0x30b   : > { %1373 = vlog2.f32 %v528_v54 }
 0x310   : > { %1035 = vperm.xlu0 %1309, %v1012_v14  }
 0x312   : > { %v1021_v28 = vpop.permute.xlu0 %1020 }
 0x313   : > { %vm1039_vm1 = vcmp.eq.s32.totalorder %v1556_v18, %v1021_v28  ;;  %v639_v28 = vshll.u32 %v638_v26, 16 }
 0x314   : > { %v1047_v31 = vsel %vm1039_vm1, %v549_v47, 0.0  ;;  %v583_v47 = vshll.u32 %v582_v29, 16 }
 0x315   : > { %v1054_v50 = vadd.f32 %v1053_v0, %v1047_v31  ;;  %v1944_v0 = vld [vmem:[%s1840_s11 + $0x30] sm:$0xff]  ;;  %v653_v31 = vshll.u32 %v652_v22, 16  ;;  %s1381_s11 = scalar_lea.vmem %s1380_s9, 256 }
 0x316   : > { %v1003_v36 = vadd.s32 16, %v1944_v0  ;;  %vm995_vm4 = vcmp.ge.s32.totalorder %v1944_v0, 0  ;;  %p1383_p1 = scmp.lt.s32.totalorder %s1381_s11, %s1375_s8 }
 0x317   : > { %v1055_v8 = vadd.f32 %v1054_v50, %v1048_v35 }
 0x318   : > { %v1374_v23 = vpop.eup %1373  ;;  %v1011_v52 = vsel %vm995_vm4, %v1003_v36, 4294967295  ;;  %p1384_p2 = por %p1383_p1, %p1382_p0 }
 0x319   : > { %v544_v33 = vmul.f32 0.6931472, %v1374_v23  ;;  %v1056_v10 = vadd.f32 %v1055_v8, %v1049_v9 }
 0x31a   : > { %p1385_p3 = pnand %p1384_p2, %p1378_p13 }
 0x31b   : > { %v1938_v51 = vsub.f32 %v1868_v6, %v544_v33  ;;  %v1940_v46 = vadd.f32 %v1056_v10, %v1050_v37  ;;  %v596_v6 = vcvt.f32.s32 %v1888_v38  ;;  %v611_v38 = vshll.u32 %v610_v3, 16 }
 0x31d   : > { %v938_v61 = vmul.f32 %v930_v24, %v1938_v51  ;;  %v597_v39 = vshll.u32 %v596_v6, 16 }
 0x31f   : > { %952 = vadd.xlane.f32.xlu1 %v938_v61 }
 0x330   : > { %1032 = vperm.xlu1 %1310, %v1011_v52  }
 0x355   : > { %v580_v48 = vpop.xlane.xlu0 %579 }
 0x356   : > { %v581_v60 = vcvt.f32.s32 %v580_v48 }
 0x358   : > { %v584_v45 = vadd.s32 %v583_v47, %v581_v60 }
 0x359   : > { %v608_v57 = vpop.xlane.xlu0 %607 }
 0x35a   : > { %v609_v11 = vcvt.f32.s32 %v608_v57  ;;  %vm683_vm6 = vcmp.eq.s32.totalorder %v584_v45, %v1843_v55  ;;  %v680_v57 = vcvt.f32.s32 %v1909_v17 }
 0x35b   : > { %v1177_v32 = vsel %vm683_vm6, 1.0, %v1439_v44 }
 0x35c   : > { %v594_v34 = vpop.xlane.xlu1 %593  ;;  %v612_v62 = vadd.s32 %v611_v38, %v609_v11 }
 0x35d   : > { %v595_v43 = vcvt.f32.s32 %v594_v34  ;;  %v636_v12 = vpop.xlane.xlu0 %635 }
 0x35e   : > { %v637_v49 = vcvt.f32.s32 %v636_v12  ;;  %vm685_vm8 = vcmp.eq.s32.totalorder %v612_v62, %v1872_v20 }
 0x35f   : > { %v598_v2 = vadd.s32 %v597_v39, %v595_v43  ;;  %v1179_v16 = vsel %vm685_vm8, 1.0, %v1439_v44 }
 0x360   : > { %v622_v30 = vpop.xlane.xlu1 %621  ;;  %v640_v50 = vadd.s32 %v639_v28, %v637_v49 }
 0x361   : > { %v623_v59 = vcvt.f32.s32 %v622_v30  ;;  %vm684_vm5 = vcmp.eq.s32.totalorder %v598_v2, %v1846_v56  ;;  %v681_v2 = vshll.u32 %v680_v57, 16 }
 0x362   : > { %v1178_v7 = vsel %vm684_vm5, 1.0, %v1439_v44  ;;  %vm687_vm11 = vcmp.eq.s32.totalorder %v640_v50, %v1858_v4  ;;  %v666_v4 = vcvt.f32.s32 %v1905_v15 }
 0x363   : > { %v626_v54 = vadd.s32 %v625_v21, %v623_v59  ;;  %v1181_v52 = vsel %vm687_vm11, 1.0, %v1439_v44 }
 0x364   : > { %v650_v58 = vpop.xlane.xlu1 %649  ;;  %v667_v47 = vshll.u32 %v666_v4, 16 }
 0x365   : > { %v651_v14 = vcvt.f32.s32 %v650_v58  ;;  %vm686_vm9 = vcmp.eq.s32.totalorder %v626_v54, %v1853_v63 }
 0x366   : > { %v1180_v9 = vsel %vm686_vm9, 1.0, %v1439_v44 }
 0x367   : > { %v654_v41 = vadd.s32 %v653_v31, %v651_v14 }
 0x368   : > { %v1950_v1 = vpop.xlane.xlu1 %677 }
 0x369   : > { %vm688_vm10 = vcmp.eq.s32.totalorder %v654_v41, %v1863_v5  ;;  %v679_v39 = vcvt.f32.s32 %v1950_v1 }
 0x36a   : > { %v1182_v61 = vsel %vm688_vm10, 1.0, %v1439_v44 }
 0x36b   : > { %v682_v3 = vadd.s32 %v681_v2, %v679_v39 }
 0x36c   : > { %v664_v40 = vpop.xlane.xlu1 %663 }
 0x36d   : > { %v665_v60 = vcvt.f32.s32 %v664_v40  ;;  %vm690_vm12 = vcmp.eq.s32.totalorder %v682_v3, %v1929_v25 }
 0x36e   : > { %v1184_v11 = vsel %vm690_vm12, 1.0, %v1439_v44 }
 0x36f   : > { %v668_v13 = vadd.s32 %v667_v47, %v665_v60 }
 0x371   : > { %vm689_vm13 = vcmp.eq.s32.totalorder %v668_v13, %v1944_v0 }
 0x372   : > { %v1183_v12 = vsel %vm689_vm13, 1.0, %v1439_v44 }
 0x373   : > { %v943_v53 = vpop.xlane.xlu0 %942 }
 0x374   : > { %v957_v27 = vmul.f32 %v1178_v7, %v943_v53 }
 0x375   : > { %v941_v56 = vpop.xlane.xlu1 %940 }
 0x376   : > { %v956_v42 = vmul.f32 %v1177_v32, %v941_v56  ;;  %v966_v55 = vsel %vm964_vm7, %v957_v27, 0.0 }
 0x377   : > { %v947_v35 = vpop.xlane.xlu0 %946 }
 0x378   : > { %v965_v8 = vsel %vm964_vm7, %v956_v42, 0.0  ;;  %v959_v10 = vmul.f32 %v1180_v9, %v947_v35 }
 0x379   : > { %v967_v23 = vadd.f32 %v966_v55, %v965_v8 }
 0x37a   : > { %v970_v30 = vsel %vm964_vm7, %v959_v10, 0.0 }
 0x37b   : > { %v945_v33 = vpop.xlane.xlu0 %944  ;;  %v951_v24 = vpop.xlane.xlu1 %950 }
 0x37c   : > { %v958_v37 = vmul.f32 %v1179_v16, %v945_v33  ;;  %v961_v63 = vmul.f32 %v1182_v61, %v951_v24 }
 0x37e   : > { %v968_v20 = vsel %vm964_vm7, %v958_v37, 0.0  ;;  %v974_v5 = vsel %vm964_vm7, %v961_v63, 0.0 }
 0x37f   : > { %v969_v36 = vadd.f32 %v968_v20, %v967_v23  ;;  %v949_v34 = vpop.xlane.xlu0 %948 }
 0x380   : > { %v960_v48 = vmul.f32 %v1181_v52, %v949_v34 }
 0x381   : > { %v971_v58 = vadd.f32 %v970_v30, %v969_v36 }
 0x382   : > { %v972_v6 = vsel %vm964_vm7, %v960_v48, 0.0 }
 0x383   : > { %v973_v29 = vadd.f32 %v972_v6, %v971_v58  ;;  %v955_v45 = vpop.xlane.xlu0 %954 }
 0x384   : > { %v963_v38 = vmul.f32 %v1184_v11, %v955_v45 }
 0x385   : > { %v975_v43 = vadd.f32 %v974_v5, %v973_v29 }
 0x386   : > { %v978_v40 = vsel %vm964_vm7, %v963_v38, 0.0 }
 0x38b   : > { %v1036_v15 = vpop.permute.xlu0 %1035 }
 0x38c   : > { %vm1044_vm14 = vcmp.eq.s32.totalorder %v1556_v18, %v1036_v15 }
 0x38d   : > { %v1052_v62 = vsel %vm1044_vm14, %v1925_v19, 0.0 }
 0x3a8   : > { %v953_v59 = vpop.xlane.xlu1 %952 }
 0x3a9   : > { %v962_v26 = vmul.f32 %v1183_v12, %v953_v59 }
 0x3ab   : > { %v976_v17 = vsel %vm964_vm7, %v962_v26, 0.0 }
 0x3ac   : > { %v1033_v21 = vpop.permute.xlu1 %1032  ;;  %v977_v1 = vadd.f32 %v976_v17, %v975_v43 }
 0x3ad   : > { %vm1043_vm15 = vcmp.eq.s32.totalorder %v1556_v18, %v1033_v21 }
 0x3ae   : > { %v1051_v25 = vsel %vm1043_vm15, %v1938_v51, 0.0  ;;  %v979_v0 = vadd.f32 %v978_v40, %v977_v1 }
 0x3af   : > { %v1058_v22 = vadd.f32 %v1940_v46, %v1051_v25 }
 0x3b0   : > { %980 = vadd.xlane.f32.xlu1 %v979_v0 }
 0x3b1   : > { %v1059_v49 = vadd.f32 %v1058_v22, %v1052_v62 }
 0x3b3   : > { %1060 = vadd.xlane.f32.xlu0 %v1059_v49 }
 0x439   : > { %v981_v44 = vpop.xlane.xlu1 %980 }
 0x43a   : > { %v982_v7 = vrot.slane %v981_v44, 4 }
 0x43c   : > { %v983_v53 = vadd.f32 %v982_v7, %v981_v44  ;;  %v1061_v54 = vpop.xlane.xlu0 %1060 }
 0x43d   : > { %v1062_v14 = vrot.slane %v1061_v54, 4 }
 0x43e   : > { %v984_v18 = vrot.slane %v983_v53, 2 }
 0x43f   : > { %v1063_v27 = vadd.f32 %v1062_v14, %v1061_v54 }
 0x440   : > { %v985_v28 = vadd.f32 %v984_v18, %v983_v53 }
 0x441   : > { %v1064_v56 = vrot.slane %v1063_v27, 2 }
 0x442   : > { %v986_v51 = vrot.slane %v985_v28, 1 }
 0x443   : > { %v1065_v32 = vadd.f32 %v1064_v56, %v1063_v27 }
 0x444   : > { %v987_v31 = vadd.f32 %v986_v51, %v985_v28 }
 0x445   : > { %v1066_v46 = vrot.slane %v1065_v32, 1 }
 0x446   : > { %1263 = vpush %v987_v31 }
 0x447   : > { %v1067_v19 = vadd.f32 %v1066_v46, %v1065_v32 }
 0x449   : > { %1265 = vpush %v1067_v19 }
 0x477   : > { %s1264_s12 = spop %1263 }
 0x478   : > { %s1070_s23 = smul.f32 0.5, %s1264_s12 }
 0x47a   : > { %s1266_s14 = spop %1265 }
 0x47b   : > { %s1069_s27 = ssub.f32 0.0, %s1266_s14 }
 0x47d   : > { %s1071_s28 = sadd.f32 %s1070_s23, %s1069_s27 }
 0x47f   : > { %v1072_v42 = vstv %s1071_s28 }
 0x480   : > { %1073 = vst [vmem:[%s207_s20] sm:$0xff] %v1072_v42 }
 0x481   : > { %1388 = shalt.err (!%p1385_p3)
}
 0x482   : > { %s1389_s10 = scalar_lea.hbm %s1985_s6, 128  ;;  %s1393_s13 = scalar_lea.hbm %s2024_s4, 512 }
 0x483   : > { %p1390_p4 = scmp.ne.s32.totalorder %s1985_s6, %s1389_s10  ;;  %p1394_p9 = scmp.lt.s32.totalorder %s1985_s6, %s2024_s4 }
 0x484   : > { %p1395_p10 = scmp.lt.s32.totalorder %s1393_s13, %s1389_s10 }
 0x485   : > { %p1391_p7 = pnand %p1390_p4, %p1504_p5 }
 0x486   : > { %p1396_p11 = por %p1395_p10, %p1394_p9 }
 0x487   : > { %p1392_p8 = pneg %p1391_p7 }
 0x489   : > { %p1397_p12 = pnand %p1396_p11, %p1392_p8 }
 0x48b   : > { %1400 = shalt.err (!%p1397_p12)
}
 0x48c   : > { %1267 = dma.vmem_to_hbm [thread:$0]  (%p1504_p5), %s1089_s22, 128, %s1985_s6, %s1075_s7  }
 0x48d PF: > { %p1273_p13 = scmp.ge.s32.totalorder %s1435_s18, 2  ;;  %s1100_s23 = sand.u32 1, %s1423_s15  }
 0x48e   : > { %s1101_s27 = scalar_lea.sflag [#allocation3], %s1100_s23 }
 0x48f   : > { %p1270_p0 = pnand %p1273_p13, %p1508_p6 }
 0x491   : > { %p1271_p1 = pneg %p1270_p0 }
 0x493   : > { %1418 = dma.done.wait (%p1271_p1), %s1101_s27, 128  }
 0x494   : > { %1420 = vsyncadd (%p1271_p1), %s1101_s27, 4294967168  ;;  %p14_p2 = scmp.ge.s32.totalorder %s1491_s21, 6   ;;  %s2029_s15 = smov %s1427_s16 }
 0x495   : > { %s2030_s16 = smov %s1431_s17  ;;  %s2031_s17 = smov %s1502_s24 }
 0x496   : > { %s2032_s18 = smov %s1491_s21  ;;  %16 = sbr.rel (!%p14_p2) target bundleno = 3 (0x3), region = 74 }
 0x49b   :  { %1106 = vsyncpa [#allocation3], 1 }
 0x49c   :  { %1108 = vsyncpa [#allocation3 + $0x1], 1 }

</bundles_post_ra>
